<compile_context>
chip_gen: v6e
topology: v6e:2x2x1
jax: 0.10.0
libtpu: 0.0.40
codegen_flags: <defaults>
</compile_context>

<pallas_src>
import jax
import jax.numpy as jnp
from jax.experimental import pallas as pl
from jax.experimental.pallas import tpu as pltpu


# ----------------------------------------------------------------------------
# Kernel
# ----------------------------------------------------------------------------
def _make_kernel(num_layers):
    """One grid step = one block of TK timesteps, fused block-diagonal MLP."""

    def kernel(x_ref, *refs):
        # refs = (w0, b0, w1, b1, ..., out_ref)
        out_ref = refs[-1]
        param_refs = refs[:-1]

        h = x_ref[...]                                    # (B, TK*D_in)
        for l in range(num_layers):
            w = param_refs[2 * l][0]                      # (TK*in_l, TK*out_l)
            b = param_refs[2 * l + 1][0]                  # (1, TK*out_l), f32
            # Matmul in the weights' dtype (f32 or bf16) with f32 accumulation
            # on the MXU; elementwise (bias, ReLU) stays f32 (v5e-friendly).
            h = jnp.dot(h.astype(w.dtype), w,
                        preferred_element_type=jnp.float32)
            h = h + b.astype(jnp.float32)
            if l < num_layers - 1:
                h = jnp.maximum(h, 0.0)
        # Single full-width lane-dense store for this block of timesteps.
        out_ref[...] = h.astype(out_ref.dtype)

    return kernel


# ----------------------------------------------------------------------------
# One-time parameter packing (hoisted out of the forward hot path)
# ----------------------------------------------------------------------------
def prepare_params(weights, biases, *, n_steps=1, compute_dtype=jnp.float32):
    """Pack per-timestep params into block-diagonal weights + lane-dense biases.

    weights[l]: (T, in_l, out_l); biases[l]: (T, 1, out_l) or (T, out_l).
    Returns (packed_w, packed_b, TK) where
      packed_w[l]: (n_steps, TK*in_l, TK*out_l), dtype=compute_dtype
      packed_b[l]: (n_steps, 1, TK*out_l), float32
    Call once per parameter update, NOT per forward call (the dtype cast and
    block-diagonal construction are a separate HBM pass).
    """
    T = weights[0].shape[0]
    assert T % n_steps == 0, "T must be divisible by n_steps"
    TK = T // n_steps

    packed_w, packed_b = [], []
    for w, b in zip(weights, biases):
        _, din, dout = w.shape
        w4 = w.astype(compute_dtype).reshape(n_steps, TK, din, dout)
        eye = jnp.eye(TK, dtype=compute_dtype)
        # blk[s, t, i, u, o] = w4[s, t, i, o] * (t == u)  -> block diagonal
        blk = jnp.einsum("stio,tu->stiuo", w4, eye)
        packed_w.append(blk.reshape(n_steps, TK * din, TK * dout))
        packed_b.append(
            b.astype(jnp.float32).reshape(n_steps, 1, TK * dout))
    return packed_w, packed_b, TK


# ----------------------------------------------------------------------------
# Forward pass (hot path)
# ----------------------------------------------------------------------------
def ffn_net_per_timestep(x_btd, packed_w, packed_b, TK):
    """x_btd: (B, T, D_in); packed_w / packed_b from prepare_params."""
    B, T, D_in = x_btd.shape
    num_layers = len(packed_w)
    D_out = packed_w[-1].shape[-1] // TK
    n_steps = T // TK
    assert n_steps * TK == T

    # Contiguous, relayout-free reshape to a lane-dense (B, T*D_in) slab.
    x_flat = x_btd.reshape(B, T * D_in)

    in_specs = [pl.BlockSpec((B, TK * D_in), lambda i: (0, i))]
    params = []
    for l in range(num_layers):
        K_l, N_l = packed_w[l].shape[1], packed_w[l].shape[2]
        params.append(packed_w[l])
        params.append(packed_b[l])
        in_specs.append(pl.BlockSpec((1, K_l, N_l), lambda i: (i, 0, 0)))
        in_specs.append(pl.BlockSpec((1, 1, N_l), lambda i: (i, 0, 0)))

    out_spec = pl.BlockSpec((B, TK * D_out), lambda i: (0, i))

    y_flat = pl.pallas_call(
        _make_kernel(num_layers),
        out_shape=jax.ShapeDtypeStruct((B, T * D_out), x_btd.dtype),
        grid_spec=pltpu.PrefetchScalarGridSpec(
            num_scalar_prefetch=0,
            grid=(n_steps,),
            in_specs=in_specs,
            out_specs=out_spec,
        ),
        compiler_params=pltpu.CompilerParams(
            # With n_steps > 1 (e.g. 2 on v7x, provided TK*D_out % 128 == 0)
            # the timestep blocks shard across the two TensorCores.
            dimension_semantics=("parallel",)),
    )(x_flat, *params)

    # Contiguous reshape back to (B, T, D_out); no transpose / relayout.
    return y_flat.reshape(B, T, D_out)


# ----------------------------------------------------------------------------
# Parameter init + plain-JAX reference (matches the PyTorch module)
# ----------------------------------------------------------------------------
def init_params(key, sizes, T):
    """Deterministic PyTorch-Linear-style init for T independent MLPs."""
    weights, biases = [], []
    for l in range(len(sizes) - 1):
        fan_in, fan_out = sizes[l], sizes[l + 1]
        key, kw, kb = jax.random.split(key, 3)
        bound = 1.0 / jnp.sqrt(jnp.float32(fan_in))
        w = jax.random.uniform(kw, (T, fan_in, fan_out), jnp.float32, -bound, bound)
        b = jax.random.uniform(kb, (T, 1, fan_out), jnp.float32, -bound, bound)
        weights.append(w)
        biases.append(b)
    return weights, biases


def reference_forward(x_btd, weights, biases):
    """Per-timestep MLP loop, identical to FFN_net_per_timestep.forward."""
    B, T, _ = x_btd.shape
    num_layers = len(weights)
    outs = []
    for t in range(T):
        h = x_btd[:, t, :]
        for l in range(num_layers):
            h = h @ weights[l][t] + biases[l][t]
            if l < num_layers - 1:
                h = jnp.maximum(h, 0.0)
        outs.append(h)
    return jnp.stack(outs, axis=1)


if __name__ == "__main__":
    # Small, module-consistent shapes.
    B = 8                  # batch
    T = 8                  # number of timesteps (len(ts))
    sizes = [32, 64, 16]   # FFN layer sizes: in=32, hidden=64, out=16

    key = jax.random.PRNGKey(0)
    key, kx = jax.random.split(key)
    x = jax.random.normal(kx, (B, T, sizes[0]), jnp.float32)

    weights, biases = init_params(key, sizes, T)
    y_ref = reference_forward(x, weights, biases)

    # --- f32 path (tight tolerance vs reference) -----------------------------
    pw32, pb32, TK32 = prepare_params(weights, biases, n_steps=1,
                                      compute_dtype=jnp.float32)
    y = ffn_net_per_timestep(x, pw32, pb32, TK32)
    y = jax.block_until_ready(y)
    assert y.shape == (B, T, sizes[-1])
    assert jnp.allclose(y, y_ref, atol=1e-4, rtol=1e-4), "f32 mismatch vs reference"

    # --- bf16-operand path (MXU-friendly; cast hoisted into prepare_params) --
    pw16, pb16, TK16 = prepare_params(weights, biases, n_steps=1,
                                      compute_dtype=jnp.bfloat16)
    y_bf16 = ffn_net_per_timestep(x, pw16, pb16, TK16)
    y_bf16 = jax.block_until_ready(y_bf16)
    assert y_bf16.shape == (B, T, sizes[-1])
    assert jnp.allclose(y_bf16, y_ref, atol=5e-2, rtol=5e-2), "bf16 mismatch vs reference"

    # TODO(synk): on v7x, call prepare_params(..., n_steps=2) so the two
    # timestep blocks shard across both TensorCores (only valid while
    # (T//n_steps)*D_out remains a multiple of 128).

    print("KERNEL_OK")
</pallas_src>

<mosaic_0001>
module attributes {stable_mosaic.version = 11 : i64} {
  func.func @kernel(%arg0: i32, %arg1: memref<8x256xf32, #tpu.memory_space<vmem>>, %arg2: memref<1x256x512xf32, #tpu.memory_space<vmem>>, %arg3: memref<1x1x512xf32, #tpu.memory_space<vmem>>, %arg4: memref<1x512x128xf32, #tpu.memory_space<vmem>>, %arg5: memref<1x1x128xf32, #tpu.memory_space<vmem>>, %arg6: memref<8x128xf32, #tpu.memory_space<vmem>>) attributes {dimension_semantics = [#tpu.dimension_semantics<parallel>], iteration_bounds = array<i64: 1>, scalar_prefetch = 0 : i64, scratch_operands = 0 : i64, tpu.core_type = #tpu.core_type<tc>, window_params = [{transform_indices = @transform_0, window_bounds = array<i64: 8, 256>}, {transform_indices = @transform_1, window_bounds = array<i64: 1, 256, 512>}, {transform_indices = @transform_2, window_bounds = array<i64: 1, 1, 512>}, {transform_indices = @transform_3, window_bounds = array<i64: 1, 512, 128>}, {transform_indices = @transform_4, window_bounds = array<i64: 1, 1, 128>}, {transform_indices = @transform_5, window_bounds = array<i64: 8, 128>}]} {
    %c0 = arith.constant 0 : index
    %c0_0 = arith.constant 0 : index
    %0 = vector.load %arg1[%c0, %c0_0] : memref<8x256xf32, #tpu.memory_space<vmem>>, vector<8x256xf32>
    %c0_1 = arith.constant 0 : index
    %c0_2 = arith.constant 0 : index
    %c0_3 = arith.constant 0 : index
    %1 = vector.load %arg2[%c0_1, %c0_2, %c0_3] : memref<1x256x512xf32, #tpu.memory_space<vmem>>, vector<1x256x512xf32>
    %2 = vector.shape_cast %1 : vector<1x256x512xf32> to vector<256x512xf32>
    %c0_4 = arith.constant 0 : index
    %c0_5 = arith.constant 0 : index
    %c0_6 = arith.constant 0 : index
    %3 = vector.load %arg3[%c0_4, %c0_5, %c0_6] : memref<1x1x512xf32, #tpu.memory_space<vmem>>, vector<1x1x512xf32>
    %4 = vector.shape_cast %3 : vector<1x1x512xf32> to vector<1x512xf32>
    %cst = arith.constant dense<0.000000e+00> : vector<8x512xf32>
    %5 = tpu.matmul %0, %2, %cst {dimension_numbers = #tpu.dot_dimension_numbers<[1], [0], [0], [1], [0, 0, 1, 1], [], []>} : vector<8x256xf32>, vector<256x512xf32>, vector<8x512xf32> -> vector<8x512xf32>
    %6 = vector.broadcast %4 : vector<1x512xf32> to vector<8x512xf32>
    %7 = arith.addf %5, %6 : vector<8x512xf32>
    %cst_7 = arith.constant 0.000000e+00 : f32
    %8 = vector.broadcast %cst_7 : f32 to vector<8x512xf32>
    %9 = arith.maximumf %7, %8 : vector<8x512xf32>
    %c0_8 = arith.constant 0 : index
    %c0_9 = arith.constant 0 : index
    %c0_10 = arith.constant 0 : index
    %10 = vector.load %arg4[%c0_8, %c0_9, %c0_10] : memref<1x512x128xf32, #tpu.memory_space<vmem>>, vector<1x512x128xf32>
    %11 = vector.shape_cast %10 : vector<1x512x128xf32> to vector<512x128xf32>
    %c0_11 = arith.constant 0 : index
    %c0_12 = arith.constant 0 : index
    %c0_13 = arith.constant 0 : index
    %12 = vector.load %arg5[%c0_11, %c0_12, %c0_13] : memref<1x1x128xf32, #tpu.memory_space<vmem>>, vector<1x1x128xf32>
    %13 = vector.shape_cast %12 : vector<1x1x128xf32> to vector<1x128xf32>
    %cst_14 = arith.constant dense<0.000000e+00> : vector<8x128xf32>
    %14 = tpu.matmul %9, %11, %cst_14 {dimension_numbers = #tpu.dot_dimension_numbers<[1], [0], [0], [1], [0, 0, 1, 1], [], []>} : vector<8x512xf32>, vector<512x128xf32>, vector<8x128xf32> -> vector<8x128xf32>
    %15 = vector.broadcast %13 : vector<1x128xf32> to vector<8x128xf32>
    %16 = arith.addf %14, %15 : vector<8x128xf32>
    %c0_15 = arith.constant 0 : index
    %c0_16 = arith.constant 0 : index
    %17 = vector.load %arg6[%c0_15, %c0_16] : memref<8x128xf32, #tpu.memory_space<vmem>>, vector<8x128xf32>
    tpu.vector_store %arg6[%c0_15, %c0_16], %16 {strides = array<i32>} : memref<8x128xf32, #tpu.memory_space<vmem>>, vector<8x128xf32>,
    return
  }
  func.func @transform_0(%arg0: i32) -> (i32, i32) {
    %c0_i32 = arith.constant 0 : i32
    %c0_i32_0 = arith.constant 0 : i32
    return %c0_i32, %arg0 : i32, i32
  }
  func.func @transform_1(%arg0: i32) -> (i32, i32, i32) {
    %c0_i32 = arith.constant 0 : i32
    %c0_i32_0 = arith.constant 0 : i32
    %c0_i32_1 = arith.constant 0 : i32
    return %arg0, %c0_i32, %c0_i32_0 : i32, i32, i32
  }
  func.func @transform_2(%arg0: i32) -> (i32, i32, i32) {
    %c0_i32 = arith.constant 0 : i32
    %c0_i32_0 = arith.constant 0 : i32
    %c0_i32_1 = arith.constant 0 : i32
    return %arg0, %c0_i32, %c0_i32_0 : i32, i32, i32
  }
  func.func @transform_3(%arg0: i32) -> (i32, i32, i32) {
    %c0_i32 = arith.constant 0 : i32
    %c0_i32_0 = arith.constant 0 : i32
    %c0_i32_1 = arith.constant 0 : i32
    return %arg0, %c0_i32, %c0_i32_0 : i32, i32, i32
  }
  func.func @transform_4(%arg0: i32) -> (i32, i32, i32) {
    %c0_i32 = arith.constant 0 : i32
    %c0_i32_0 = arith.constant 0 : i32
    %c0_i32_1 = arith.constant 0 : i32
    return %arg0, %c0_i32, %c0_i32_0 : i32, i32, i32
  }
  func.func @transform_5(%arg0: i32) -> (i32, i32) {
    %c0_i32 = arith.constant 0 : i32
    %c0_i32_0 = arith.constant 0 : i32
    return %c0_i32, %arg0 : i32, i32
  }
}

</mosaic_0001>

<bundles_post_ra>
// kernel: tpu_custom_call.1
= control target key start
LH: loop header
LB: loop body
LE: loop exit
PB: predicated region body
PF: predicated region fallthrough
CT: control target
= control target key end

     0   :  { %10 = vsyncpa [#allocation3], 0  ;;  %s844_s0 = inlined_call_operand.hbm [shape: f32[8,256], index: 0, kind: input, shape index: {}]   ;;  %s845_s1 = inlined_call_operand.hbm [shape: f32[1,256,512], index: 1, kind: input, shape index: {}]   ;;  %s846_s2 = inlined_call_operand.hbm [shape: f32[1,1,512], index: 2, kind: input, shape index: {}]   ;;  %s847_s3 = inlined_call_operand.hbm [shape: f32[1,512,128], index: 3, kind: input, shape index: {}]   ;;  %s848_s4 = inlined_call_operand.vmem [shape: f32[1,1,128], index: 4, kind: input, shape index: {}]   ;;  %s849_s5 = inlined_call_operand.hbm [shape: f32[8,128], index: 5, kind: output, shape index: {}]  }
   0x1   :  { %11 = vsyncpa [#allocation6], 0 }
   0x2   :  { %12 = vsyncpa [#allocation9], 0 }
   0x3   :  { %13 = vsyncpa [#allocation4], 0  ;;  %s787_s18 = smov [#allocation5]  }
   0x4   :  { %s29_s19 = sshll.u32 %s787_s18, 4  ;;  %s30_s19 = int_to_ptr.vmem [resolvable:$true] %s29_s19 }
   0x5   :  { %s687_s20 = scalar_lea.vmem %s30_s19, 16384  ;;  %p692_p1 = scmp.lt.s32.totalorder %s30_s19, %s30_s19 }
   0x6   :  { %p688_p0 = scmp.ne.s32.totalorder %s30_s19, %s687_s20  ;;  %p693_p2 = scmp.lt.s32.totalorder %s687_s20, %s687_s20 }
   0x8   :  { %p694_p3 = por %p693_p2, %p692_p1 }
   0xa   :  { %p695_p4 = pnand %p694_p3, %p688_p0 }
   0xc   :  { %698 = shalt.err (!%p695_p4)
}
   0xd   :  { %s788_s21 = smov 512   ;;  %s789_s22 = smov 32  }
   0xe   :  { %35 = dma.hbm_to_vmem [thread:$0]  %s845_s1, 16384, %s30_s19, [#allocation6], %s788_s21, %s788_s21, %s789_s22  }
   0xf   :  { %s790_s25 = smov [#allocation2]   ;;  %s791_s27 = smov [#allocation7]  }
  0x10   :  { %s20_s26 = sshll.u32 %s790_s25, 4  ;;  %s42_s28 = sshll.u32 %s791_s27, 4  ;;  %s21_s26 = int_to_ptr.vmem [resolvable:$true] %s20_s26  ;;  %s43_s28 = int_to_ptr.vmem [resolvable:$true] %s42_s28 }
  0x11   :  { %s707_s29 = scalar_lea.vmem %s21_s26, 256  ;;  %p712_p6 = scmp.lt.s32.totalorder %s21_s26, %s21_s26 }
  0x12   :  { %p708_p5 = scmp.ne.s32.totalorder %s21_s26, %s707_s29  ;;  %p713_p7 = scmp.lt.s32.totalorder %s707_s29, %s707_s29 }
  0x14   :  { %p714_p8 = por %p713_p7, %p712_p6 }
  0x16   :  { %p715_p9 = pnand %p714_p8, %p708_p5 }
  0x18   :  { %718 = shalt.err (!%p715_p9)
}
  0x19   :  { %23 = dma.hbm_to_vmem [thread:$0]  %s844_s0, 256, %s21_s26, [#allocation3]  }
  0x1a   :  { %s727_s7 = scalar_lea.vmem %s43_s28, 64  ;;  %p732_p11 = scmp.lt.s32.totalorder %s43_s28, %s43_s28 }
  0x1b   :  { %p728_p10 = scmp.ne.s32.totalorder %s43_s28, %s727_s7  ;;  %p733_p12 = scmp.lt.s32.totalorder %s727_s7, %s727_s7 }
  0x1d   :  { %p734_p13 = por %p733_p12, %p732_p11 }
  0x1f   :  { %p735_p0 = pnand %p734_p13, %p728_p10 }
  0x21   :  { %738 = shalt.err (!%p735_p0)
}
  0x22   :  { %45 = dma.hbm_to_vmem [thread:$0]  %s846_s2, 64, %s43_s28, [#allocation6]  }
  0x23   :  { %s792_s9 = smov [#allocation8]  }
  0x24   :  { %s51_s10 = sshll.u32 %s792_s9, 4  ;;  %s52_s10 = int_to_ptr.vmem [resolvable:$true] %s51_s10 }
  0x25   :  { %s747_s11 = scalar_lea.vmem %s52_s10, 8192  ;;  %p752_p2 = scmp.lt.s32.totalorder %s52_s10, %s52_s10 }
  0x26   :  { %p748_p1 = scmp.ne.s32.totalorder %s52_s10, %s747_s11  ;;  %p753_p3 = scmp.lt.s32.totalorder %s747_s11, %s747_s11 }
  0x28   :  { %p754_p4 = por %p753_p3, %p752_p2 }
  0x2a   :  { %p755_p5 = pnand %p754_p4, %p748_p1 }
  0x2c   :  { %758 = shalt.err (!%p755_p5)
}
  0x2d   :  { %s793_s0 = smov 128   ;;  %s794_s12 = smov 8  }
  0x2e   :  { %57 = dma.hbm_to_vmem [thread:$0]  %s847_s3, 8192, %s52_s10, [#allocation9], %s793_s0, %s793_s0, %s794_s12  }
  0x2f   :  { %779 = dma.done.wait [#allocation3], 256  }
  0x30   :  { %780 = vsyncadd [#allocation3], 4294967040 }
  0x31   :  { %781 = dma.done.wait [#allocation6], 16448  }
  0x32   :  { %782 = vsyncadd [#allocation6], 4294950848 }
  0x33   :  { %783 = dma.done.wait [#allocation9], 8192  }
  0x34   :  { %784 = vsyncadd [#allocation9], 4294959104  ;;  %v135_v0 = vld [vmem:[#allocation5 + $0x1e8] sm:$0xff]  ;;  %v137_v1 = vld [vmem:[#allocation5 + $0x1f8] sm:$0xff]  ;;  %s795_s15 = smov [#allocation10]  }
  0x35   :  { %v134_v2 = vld [vmem:[#allocation5 + $0x1e0] sm:$0xff]  ;;  %224 = vmatprep.subr.mxu0 %v135_v0  ;;  %295 = vmatprep.subr.mxu1 %v137_v1  ;;  %v136_v3 = vld [vmem:[#allocation5 + $0x1f0] sm:$0xff]  ;;  %v131_v4 = vld [vmem:[#allocation5 + $0x1c8] sm:$0xff]  ;;  %s588_s16 = sshll.u32 %s795_s15, 4  ;;  %s589_s16 = int_to_ptr.vmem [resolvable:$true] %s588_s16 }
  0x36   :  { %v133_v5 = vld [vmem:[#allocation5 + $0x1d8] sm:$0xff]  ;;  %225 = vmatpush1.msra.mxu0 %v134_v2  ;;  %296 = vmatpush1.msra.mxu1 %v136_v3  ;;  %v130_v6 = vld [vmem:[#allocation5 + $0x1c0] sm:$0xff]  ;;  %v132_v7 = vld [vmem:[#allocation5 + $0x1d0] sm:$0xff]  ;;  %s759_s17 = scalar_lea.vmem %s589_s16, 128  ;;  %p764_p7 = scmp.lt.s32.totalorder %s589_s16, %s589_s16 }
  0x37   :  { %v127_v8 = vld [vmem:[#allocation5 + $0x1a8] sm:$0xff]  ;;  %226 = vmatprep.subr.mxu0 %v131_v4  ;;  %297 = vmatprep.subr.mxu1 %v133_v5  ;;  %v129_v9 = vld [vmem:[#allocation5 + $0x1b8] sm:$0xff]  ;;  %v126_v10 = vld [vmem:[#allocation5 + $0x1a0] sm:$0xff]  ;;  %p760_p6 = scmp.ne.s32.totalorder %s589_s16, %s759_s17  ;;  %p765_p8 = scmp.lt.s32.totalorder %s759_s17, %s759_s17 }
  0x38   :  { %v128_v11 = vld [vmem:[#allocation5 + $0x1b0] sm:$0xff]  ;;  %227 = vmatpush1.msra.mxu0 %v130_v6  ;;  %298 = vmatpush1.msra.mxu1 %v132_v7  ;;  %v123_v12 = vld [vmem:[#allocation5 + $0x188] sm:$0xff]  ;;  %v125_v13 = vld [vmem:[#allocation5 + $0x198] sm:$0xff] }
  0x39   :  { %228 = vmatprep.subr.mxu0 %v127_v8  ;;  %299 = vmatprep.subr.mxu1 %v129_v9  ;;  %v122_v14 = vld [vmem:[#allocation5 + $0x180] sm:$0xff]  ;;  %v124_v15 = vld [vmem:[#allocation5 + $0x190] sm:$0xff]  ;;  %v119_v16 = vld [vmem:[#allocation5 + $0x168] sm:$0xff]  ;;  %p766_p9 = por %p765_p8, %p764_p7 }
  0x3a   :  { %229 = vmatpush1.msra.mxu0 %v126_v10  ;;  %300 = vmatpush1.msra.mxu1 %v128_v11  ;;  %v121_v17 = vld [vmem:[#allocation5 + $0x178] sm:$0xff]  ;;  %v118_v18 = vld [vmem:[#allocation5 + $0x160] sm:$0xff]  ;;  %v120_v19 = vld [vmem:[#allocation5 + $0x170] sm:$0xff] }
  0x3b   :  { %230 = vmatprep.subr.mxu0 %v123_v12  ;;  %301 = vmatprep.subr.mxu1 %v125_v13  ;;  %v115_v20 = vld [vmem:[#allocation5 + $0x148] sm:$0xff]  ;;  %v117_v21 = vld [vmem:[#allocation5 + $0x158] sm:$0xff]  ;;  %v114_v22 = vld [vmem:[#allocation5 + $0x140] sm:$0xff]  ;;  %p767_p10 = pnand %p766_p9, %p760_p6 }
  0x3c   :  { %231 = vmatpush1.msra.mxu0 %v122_v14  ;;  %302 = vmatpush1.msra.mxu1 %v124_v15  ;;  %v116_v23 = vld [vmem:[#allocation5 + $0x150] sm:$0xff]  ;;  %v111_v24 = vld [vmem:[#allocation5 + $0x128] sm:$0xff]  ;;  %v113_v25 = vld [vmem:[#allocation5 + $0x138] sm:$0xff] }
  0x3d   :  { %232 = vmatprep.subr.mxu0 %v119_v16  ;;  %303 = vmatprep.subr.mxu1 %v121_v17  ;;  %v110_v26 = vld [vmem:[#allocation5 + $0x120] sm:$0xff]  ;;  %v112_v27 = vld [vmem:[#allocation5 + $0x130] sm:$0xff]  ;;  %v107_v28 = vld [vmem:[#allocation5 + $0x108] sm:$0xff] }
  0x3e   :  { %233 = vmatpush1.msra.mxu0 %v118_v18  ;;  %304 = vmatpush1.msra.mxu1 %v120_v19  ;;  %v109_v29 = vld [vmem:[#allocation5 + $0x118] sm:$0xff]  ;;  %v106_v30 = vld [vmem:[#allocation5 + $0x100] sm:$0xff]  ;;  %v108_v31 = vld [vmem:[#allocation5 + $0x110] sm:$0xff] }
  0x3f   :  { %234 = vmatprep.subr.mxu0 %v115_v20  ;;  %305 = vmatprep.subr.mxu1 %v117_v21  ;;  %v103_v32 = vld [vmem:[#allocation5 + $0xe8] sm:$0xff]  ;;  %v105_v33 = vld [vmem:[#allocation5 + $0xf8] sm:$0xff]  ;;  %v102_v34 = vld [vmem:[#allocation5 + $0xe0] sm:$0xff] }
  0x40   :  { %235 = vmatpush1.msra.mxu0 %v114_v22  ;;  %306 = vmatpush1.msra.mxu1 %v116_v23  ;;  %v104_v35 = vld [vmem:[#allocation5 + $0xf0] sm:$0xff]  ;;  %v99_v36 = vld [vmem:[#allocation5 + $0xc8] sm:$0xff]  ;;  %v101_v37 = vld [vmem:[#allocation5 + $0xd8] sm:$0xff] }
  0x41   :  { %236 = vmatprep.subr.mxu0 %v111_v24  ;;  %307 = vmatprep.subr.mxu1 %v113_v25  ;;  %v98_v38 = vld [vmem:[#allocation5 + $0xc0] sm:$0xff]  ;;  %v100_v39 = vld [vmem:[#allocation5 + $0xd0] sm:$0xff]  ;;  %v95_v40 = vld [vmem:[#allocation5 + $0xa8] sm:$0xff] }
  0x42   :  { %237 = vmatpush1.msra.mxu0 %v110_v26  ;;  %308 = vmatpush1.msra.mxu1 %v112_v27  ;;  %v97_v41 = vld [vmem:[#allocation5 + $0xb8] sm:$0xff]  ;;  %v94_v42 = vld [vmem:[#allocation5 + $0xa0] sm:$0xff]  ;;  %v96_v43 = vld [vmem:[#allocation5 + $0xb0] sm:$0xff] }
  0x43   :  { %238 = vmatprep.subr.mxu0 %v107_v28  ;;  %309 = vmatprep.subr.mxu1 %v109_v29  ;;  %v91_v44 = vld [vmem:[#allocation5 + $0x88] sm:$0xff]  ;;  %v93_v45 = vld [vmem:[#allocation5 + $0x98] sm:$0xff]  ;;  %v90_v46 = vld [vmem:[#allocation5 + $0x80] sm:$0xff] }
  0x44   :  { %239 = vmatpush1.msra.mxu0 %v106_v30  ;;  %310 = vmatpush1.msra.mxu1 %v108_v31  ;;  %v92_v47 = vld [vmem:[#allocation5 + $0x90] sm:$0xff]  ;;  %v87_v48 = vld [vmem:[#allocation5 + $0x68] sm:$0xff]  ;;  %v89_v49 = vld [vmem:[#allocation5 + $0x78] sm:$0xff] }
  0x45   :  { %240 = vmatprep.subr.mxu0 %v103_v32  ;;  %311 = vmatprep.subr.mxu1 %v105_v33  ;;  %v86_v50 = vld [vmem:[#allocation5 + $0x60] sm:$0xff]  ;;  %v88_v51 = vld [vmem:[#allocation5 + $0x70] sm:$0xff]  ;;  %v83_v52 = vld [vmem:[#allocation5 + $0x48] sm:$0xff] }
  0x46   :  { %241 = vmatpush1.msra.mxu0 %v102_v34  ;;  %312 = vmatpush1.msra.mxu1 %v104_v35  ;;  %v85_v53 = vld [vmem:[#allocation5 + $0x58] sm:$0xff]  ;;  %v82_v54 = vld [vmem:[#allocation5 + $0x40] sm:$0xff]  ;;  %v84_v55 = vld [vmem:[#allocation5 + $0x50] sm:$0xff] }
  0x47   :  { %242 = vmatprep.subr.mxu0 %v99_v36  ;;  %313 = vmatprep.subr.mxu1 %v101_v37  ;;  %v79_v56 = vld [vmem:[#allocation5 + $0x28] sm:$0xff]  ;;  %v81_v57 = vld [vmem:[#allocation5 + $0x38] sm:$0xff]  ;;  %v78_v58 = vld [vmem:[#allocation5 + $0x20] sm:$0xff] }
  0x48   :  { %243 = vmatpush1.msra.mxu0 %v98_v38  ;;  %314 = vmatpush1.msra.mxu1 %v100_v39  ;;  %v80_v59 = vld [vmem:[#allocation5 + $0x30] sm:$0xff]  ;;  %v75_v60 = vld [vmem:[#allocation5 + $0x8] sm:$0xff]  ;;  %v77_v61 = vld [vmem:[#allocation5 + $0x18] sm:$0xff] }
  0x49   :  { %244 = vmatprep.subr.mxu0 %v95_v40  ;;  %315 = vmatprep.subr.mxu1 %v97_v41  ;;  %v74_v62 = vld [vmem:[#allocation5] sm:$0xff]  ;;  %v76_v63 = vld [vmem:[#allocation5 + $0x10] sm:$0xff]  ;;  %v199_v0 = vld [vmem:[#allocation5 + $0x3e8] sm:$0xff] }
  0x4a   :  { %245 = vmatpush1.msra.mxu0 %v94_v42  ;;  %316 = vmatpush1.msra.mxu1 %v96_v43  ;;  %v201_v1 = vld [vmem:[#allocation5 + $0x3f8] sm:$0xff]  ;;  %v198_v2 = vld [vmem:[#allocation5 + $0x3e0] sm:$0xff]  ;;  %v200_v3 = vld [vmem:[#allocation5 + $0x3f0] sm:$0xff] }
  0x4b   :  { %246 = vmatprep.subr.mxu0 %v91_v44  ;;  %317 = vmatprep.subr.mxu1 %v93_v45  ;;  %v195_v4 = vld [vmem:[#allocation5 + $0x3c8] sm:$0xff]  ;;  %v197_v5 = vld [vmem:[#allocation5 + $0x3d8] sm:$0xff]  ;;  %v194_v6 = vld [vmem:[#allocation5 + $0x3c0] sm:$0xff] }
  0x4c   :  { %247 = vmatpush1.msra.mxu0 %v90_v46  ;;  %318 = vmatpush1.msra.mxu1 %v92_v47  ;;  %v196_v7 = vld [vmem:[#allocation5 + $0x3d0] sm:$0xff]  ;;  %v191_v8 = vld [vmem:[#allocation5 + $0x3a8] sm:$0xff]  ;;  %v193_v9 = vld [vmem:[#allocation5 + $0x3b8] sm:$0xff] }
  0x4d   :  { %248 = vmatprep.subr.mxu0 %v87_v48  ;;  %319 = vmatprep.subr.mxu1 %v89_v49  ;;  %v190_v10 = vld [vmem:[#allocation5 + $0x3a0] sm:$0xff]  ;;  %v192_v11 = vld [vmem:[#allocation5 + $0x3b0] sm:$0xff]  ;;  %v187_v12 = vld [vmem:[#allocation5 + $0x388] sm:$0xff] }
  0x4e   :  { %249 = vmatpush1.msra.mxu0 %v86_v50  ;;  %320 = vmatpush1.msra.mxu1 %v88_v51  ;;  %v189_v13 = vld [vmem:[#allocation5 + $0x398] sm:$0xff]  ;;  %v186_v14 = vld [vmem:[#allocation5 + $0x380] sm:$0xff]  ;;  %v188_v15 = vld [vmem:[#allocation5 + $0x390] sm:$0xff] }
  0x4f   :  { %250 = vmatprep.subr.mxu0 %v83_v52  ;;  %321 = vmatprep.subr.mxu1 %v85_v53  ;;  %v183_v16 = vld [vmem:[#allocation5 + $0x368] sm:$0xff]  ;;  %v185_v17 = vld [vmem:[#allocation5 + $0x378] sm:$0xff]  ;;  %v182_v18 = vld [vmem:[#allocation5 + $0x360] sm:$0xff] }
  0x50   :  { %251 = vmatpush1.msra.mxu0 %v82_v54  ;;  %322 = vmatpush1.msra.mxu1 %v84_v55  ;;  %v184_v19 = vld [vmem:[#allocation5 + $0x370] sm:$0xff]  ;;  %v179_v20 = vld [vmem:[#allocation5 + $0x348] sm:$0xff]  ;;  %v181_v21 = vld [vmem:[#allocation5 + $0x358] sm:$0xff] }
  0x51   :  { %252 = vmatprep.subr.mxu0 %v79_v56  ;;  %323 = vmatprep.subr.mxu1 %v81_v57  ;;  %v178_v22 = vld [vmem:[#allocation5 + $0x340] sm:$0xff]  ;;  %v180_v23 = vld [vmem:[#allocation5 + $0x350] sm:$0xff]  ;;  %v175_v24 = vld [vmem:[#allocation5 + $0x328] sm:$0xff] }
  0x52   :  { %253 = vmatpush1.msra.mxu0 %v78_v58  ;;  %324 = vmatpush1.msra.mxu1 %v80_v59  ;;  %v177_v25 = vld [vmem:[#allocation5 + $0x338] sm:$0xff]  ;;  %v174_v26 = vld [vmem:[#allocation5 + $0x320] sm:$0xff]  ;;  %v176_v27 = vld [vmem:[#allocation5 + $0x330] sm:$0xff] }
  0x53   :  { %254 = vmatprep.subr.mxu0 %v75_v60  ;;  %325 = vmatprep.subr.mxu1 %v77_v61  ;;  %v171_v28 = vld [vmem:[#allocation5 + $0x308] sm:$0xff]  ;;  %v173_v29 = vld [vmem:[#allocation5 + $0x318] sm:$0xff]  ;;  %v170_v30 = vld [vmem:[#allocation5 + $0x300] sm:$0xff] }
  0x54   :  { %255 = vmatpush1.msra.mxu0 %v74_v62  ;;  %326 = vmatpush1.msra.mxu1 %v76_v63  ;;  %v172_v31 = vld [vmem:[#allocation5 + $0x310] sm:$0xff]  ;;  %v167_v32 = vld [vmem:[#allocation5 + $0x2e8] sm:$0xff]  ;;  %v169_v33 = vld [vmem:[#allocation5 + $0x2f8] sm:$0xff] }
  0x55   :  { %256 = vmatprep.subr.mxu0 %v199_v0  ;;  %327 = vmatprep.subr.mxu1 %v201_v1  ;;  %v166_v34 = vld [vmem:[#allocation5 + $0x2e0] sm:$0xff]  ;;  %v168_v35 = vld [vmem:[#allocation5 + $0x2f0] sm:$0xff]  ;;  %v163_v36 = vld [vmem:[#allocation5 + $0x2c8] sm:$0xff] }
  0x56   :  { %257 = vmatpush2.msra.mxu0 %v198_v2  ;;  %328 = vmatpush2.msra.mxu1 %v200_v3  ;;  %v165_v37 = vld [vmem:[#allocation5 + $0x2d8] sm:$0xff]  ;;  %v162_v38 = vld [vmem:[#allocation5 + $0x2c0] sm:$0xff]  ;;  %v164_v39 = vld [vmem:[#allocation5 + $0x2d0] sm:$0xff] }
  0x57   :  { %258 = vmatprep.subr.mxu0 %v195_v4  ;;  %329 = vmatprep.subr.mxu1 %v197_v5  ;;  %v159_v40 = vld [vmem:[#allocation5 + $0x2a8] sm:$0xff]  ;;  %v161_v41 = vld [vmem:[#allocation5 + $0x2b8] sm:$0xff]  ;;  %v158_v42 = vld [vmem:[#allocation5 + $0x2a0] sm:$0xff] }
  0x58   :  { %259 = vmatpush2.msra.mxu0 %v194_v6  ;;  %330 = vmatpush2.msra.mxu1 %v196_v7  ;;  %v160_v43 = vld [vmem:[#allocation5 + $0x2b0] sm:$0xff]  ;;  %v155_v44 = vld [vmem:[#allocation5 + $0x288] sm:$0xff]  ;;  %v157_v45 = vld [vmem:[#allocation5 + $0x298] sm:$0xff] }
  0x59   :  { %260 = vmatprep.subr.mxu0 %v191_v8  ;;  %331 = vmatprep.subr.mxu1 %v193_v9  ;;  %v154_v46 = vld [vmem:[#allocation5 + $0x280] sm:$0xff]  ;;  %v156_v47 = vld [vmem:[#allocation5 + $0x290] sm:$0xff]  ;;  %v151_v48 = vld [vmem:[#allocation5 + $0x268] sm:$0xff] }
  0x5a   :  { %261 = vmatpush2.msra.mxu0 %v190_v10  ;;  %332 = vmatpush2.msra.mxu1 %v192_v11  ;;  %v153_v49 = vld [vmem:[#allocation5 + $0x278] sm:$0xff]  ;;  %v150_v50 = vld [vmem:[#allocation5 + $0x260] sm:$0xff]  ;;  %v152_v51 = vld [vmem:[#allocation5 + $0x270] sm:$0xff] }
  0x5b   :  { %262 = vmatprep.subr.mxu0 %v187_v12  ;;  %333 = vmatprep.subr.mxu1 %v189_v13  ;;  %v147_v52 = vld [vmem:[#allocation5 + $0x248] sm:$0xff]  ;;  %v149_v53 = vld [vmem:[#allocation5 + $0x258] sm:$0xff]  ;;  %v146_v54 = vld [vmem:[#allocation5 + $0x240] sm:$0xff] }
  0x5c   :  { %263 = vmatpush2.msra.mxu0 %v186_v14  ;;  %334 = vmatpush2.msra.mxu1 %v188_v15  ;;  %v148_v55 = vld [vmem:[#allocation5 + $0x250] sm:$0xff]  ;;  %v143_v56 = vld [vmem:[#allocation5 + $0x228] sm:$0xff]  ;;  %v145_v57 = vld [vmem:[#allocation5 + $0x238] sm:$0xff] }
  0x5d   :  { %264 = vmatprep.subr.mxu0 %v183_v16  ;;  %335 = vmatprep.subr.mxu1 %v185_v17  ;;  %v142_v58 = vld [vmem:[#allocation5 + $0x220] sm:$0xff]  ;;  %v144_v59 = vld [vmem:[#allocation5 + $0x230] sm:$0xff]  ;;  %v139_v60 = vld [vmem:[#allocation5 + $0x208] sm:$0xff] }
  0x5e   :  { %265 = vmatpush2.msra.mxu0 %v182_v18  ;;  %336 = vmatpush2.msra.mxu1 %v184_v19  ;;  %v141_v61 = vld [vmem:[#allocation5 + $0x218] sm:$0xff]  ;;  %v138_v62 = vld [vmem:[#allocation5 + $0x200] sm:$0xff]  ;;  %v140_v0 = vld [vmem:[#allocation5 + $0x210] sm:$0xff] }
  0x5f   :  { %266 = vmatprep.subr.mxu0 %v179_v20  ;;  %337 = vmatprep.subr.mxu1 %v181_v21  ;;  %v73_v63 = vld [vmem:[#allocation2 + $0x8] sm:$0xff]  ;;  %v72_v1 = vld [vmem:[#allocation2] sm:$0xff]  ;;  %v398_v14 = vld [vmem:[#allocation8 + $0xe0] sm:$0xff] }
  0x60   :  { %267 = vmatpush2.msra.mxu0 %v178_v22  ;;  %338 = vmatpush2.msra.mxu1 %v180_v23  ;;  %v401_v2 = vld [vmem:[#allocation8 + $0xf8] sm:$0xff]  ;;  %v400_v6 = vld [vmem:[#allocation8 + $0xf0] sm:$0xff]  ;;  %v399_v10 = vld [vmem:[#allocation8 + $0xe8] sm:$0xff] }
  0x61   :  { %268 = vmatprep.subr.mxu0 %v175_v24  ;;  %339 = vmatprep.subr.mxu1 %v177_v25  ;;  %v433_v3 = vld [vmem:[#allocation8 + $0x1f8] sm:$0xff]  ;;  %v432_v7 = vld [vmem:[#allocation8 + $0x1f0] sm:$0xff]  ;;  %v431_v11 = vld [vmem:[#allocation8 + $0x1e8] sm:$0xff] }
  0x62   :  { %269 = vmatpush2.msra.mxu0 %v174_v26  ;;  %340 = vmatpush2.msra.mxu1 %v176_v27  ;;  %v385_v4 = vld [vmem:[#allocation8 + $0x78] sm:$0xff]  ;;  %v384_v8 = vld [vmem:[#allocation8 + $0x70] sm:$0xff]  ;;  %v383_v12 = vld [vmem:[#allocation8 + $0x68] sm:$0xff] }
  0x63   :  { %270 = vmatprep.subr.mxu0 %v171_v28  ;;  %341 = vmatprep.subr.mxu1 %v173_v29  ;;  %v417_v5 = vld [vmem:[#allocation8 + $0x178] sm:$0xff]  ;;  %v416_v9 = vld [vmem:[#allocation8 + $0x170] sm:$0xff]  ;;  %v415_v13 = vld [vmem:[#allocation8 + $0x168] sm:$0xff] }
  0x64   :  { %271 = vmatpush2.msra.mxu0 %v170_v30  ;;  %342 = vmatpush2.msra.mxu1 %v172_v31  ;;  %v430_v15 = vld [vmem:[#allocation8 + $0x1e0] sm:$0xff]  ;;  %v397_v18 = vld [vmem:[#allocation8 + $0xd8] sm:$0xff]  ;;  %v396_v22 = vld [vmem:[#allocation8 + $0xd0] sm:$0xff] }
  0x65   :  { %272 = vmatprep.subr.mxu0 %v167_v32  ;;  %343 = vmatprep.subr.mxu1 %v169_v33  ;;  %v382_v16 = vld [vmem:[#allocation8 + $0x60] sm:$0xff]  ;;  %v429_v19 = vld [vmem:[#allocation8 + $0x1d8] sm:$0xff]  ;;  %v428_v23 = vld [vmem:[#allocation8 + $0x1d0] sm:$0xff] }
  0x66   :  { %273 = vmatpush2.msra.mxu0 %v166_v34  ;;  %344 = vmatpush2.msra.mxu1 %v168_v35  ;;  %v414_v17 = vld [vmem:[#allocation8 + $0x160] sm:$0xff]  ;;  %v381_v20 = vld [vmem:[#allocation8 + $0x58] sm:$0xff]  ;;  %v380_v24 = vld [vmem:[#allocation8 + $0x50] sm:$0xff] }
  0x67   :  { %274 = vmatprep.subr.mxu0 %v163_v36  ;;  %345 = vmatprep.subr.mxu1 %v165_v37  ;;  %v413_v21 = vld [vmem:[#allocation8 + $0x158] sm:$0xff]  ;;  %v412_v25 = vld [vmem:[#allocation8 + $0x150] sm:$0xff]  ;;  %v395_v26 = vld [vmem:[#allocation8 + $0xc8] sm:$0xff] }
  0x68   :  { %275 = vmatpush2.msra.mxu0 %v162_v38  ;;  %346 = vmatpush2.msra.mxu1 %v164_v39  ;;  %v427_v27 = vld [vmem:[#allocation8 + $0x1c8] sm:$0xff]  ;;  %v394_v30 = vld [vmem:[#allocation8 + $0xc0] sm:$0xff]  ;;  %v393_v34 = vld [vmem:[#allocation8 + $0xb8] sm:$0xff] }
  0x69   :  { %276 = vmatprep.subr.mxu0 %v159_v40  ;;  %347 = vmatprep.subr.mxu1 %v161_v41  ;;  %v379_v28 = vld [vmem:[#allocation8 + $0x48] sm:$0xff]  ;;  %v426_v31 = vld [vmem:[#allocation8 + $0x1c0] sm:$0xff]  ;;  %v425_v35 = vld [vmem:[#allocation8 + $0x1b8] sm:$0xff] }
  0x6a   :  { %277 = vmatpush2.msra.mxu0 %v158_v42  ;;  %348 = vmatpush2.msra.mxu1 %v160_v43  ;;  %v411_v29 = vld [vmem:[#allocation8 + $0x148] sm:$0xff]  ;;  %v378_v32 = vld [vmem:[#allocation8 + $0x40] sm:$0xff]  ;;  %v377_v36 = vld [vmem:[#allocation8 + $0x38] sm:$0xff] }
  0x6b   :  { %278 = vmatprep.subr.mxu0 %v155_v44  ;;  %349 = vmatprep.subr.mxu1 %v157_v45  ;;  %v410_v33 = vld [vmem:[#allocation8 + $0x140] sm:$0xff]  ;;  %v409_v37 = vld [vmem:[#allocation8 + $0x138] sm:$0xff]  ;;  %v392_v38 = vld [vmem:[#allocation8 + $0xb0] sm:$0xff] }
  0x6c   :  { %279 = vmatpush2.msra.mxu0 %v154_v46  ;;  %350 = vmatpush2.msra.mxu1 %v156_v47  ;;  %v424_v39 = vld [vmem:[#allocation8 + $0x1b0] sm:$0xff]  ;;  %v391_v42 = vld [vmem:[#allocation8 + $0xa8] sm:$0xff]  ;;  %v390_v46 = vld [vmem:[#allocation8 + $0xa0] sm:$0xff] }
  0x6d   :  { %280 = vmatprep.subr.mxu0 %v151_v48  ;;  %351 = vmatprep.subr.mxu1 %v153_v49  ;;  %v376_v40 = vld [vmem:[#allocation8 + $0x30] sm:$0xff]  ;;  %v423_v43 = vld [vmem:[#allocation8 + $0x1a8] sm:$0xff]  ;;  %v422_v47 = vld [vmem:[#allocation8 + $0x1a0] sm:$0xff] }
  0x6e   :  { %281 = vmatpush2.msra.mxu0 %v150_v50  ;;  %352 = vmatpush2.msra.mxu1 %v152_v51  ;;  %v408_v41 = vld [vmem:[#allocation8 + $0x130] sm:$0xff]  ;;  %v375_v44 = vld [vmem:[#allocation8 + $0x28] sm:$0xff]  ;;  %v374_v48 = vld [vmem:[#allocation8 + $0x20] sm:$0xff] }
  0x6f   :  { %282 = vmatprep.subr.mxu0 %v147_v52  ;;  %353 = vmatprep.subr.mxu1 %v149_v53  ;;  %v407_v45 = vld [vmem:[#allocation8 + $0x128] sm:$0xff]  ;;  %v406_v49 = vld [vmem:[#allocation8 + $0x120] sm:$0xff]  ;;  %v389_v50 = vld [vmem:[#allocation8 + $0x98] sm:$0xff] }
  0x70   :  { %283 = vmatpush2.msra.mxu0 %v146_v54  ;;  %354 = vmatpush2.msra.mxu1 %v148_v55  ;;  %v421_v51 = vld [vmem:[#allocation8 + $0x198] sm:$0xff]  ;;  %v388_v54 = vld [vmem:[#allocation8 + $0x90] sm:$0xff] }
  0x71   :  { %284 = vmatprep.subr.mxu0 %v143_v56  ;;  %355 = vmatprep.subr.mxu1 %v145_v57  ;;  %v373_v52 = vld [vmem:[#allocation8 + $0x18] sm:$0xff]  ;;  %v420_v55 = vld [vmem:[#allocation8 + $0x190] sm:$0xff] }
  0x72   :  { %285 = vmatpush2.msra.mxu0 %v142_v58  ;;  %356 = vmatpush2.msra.mxu1 %v144_v59  ;;  %v405_v53 = vld [vmem:[#allocation8 + $0x118] sm:$0xff]  ;;  %v372_v56 = vld [vmem:[#allocation8 + $0x10] sm:$0xff]  ;;  %v387_v58 = vld [vmem:[#allocation8 + $0x88] sm:$0xff] }
  0x73   :  { %286 = vmatprep.subr.mxu0 %v139_v60  ;;  %357 = vmatprep.subr.mxu1 %v141_v61  ;;  %v404_v57 = vld [vmem:[#allocation8 + $0x110] sm:$0xff]  ;;  %v419_v59 = vld [vmem:[#allocation8 + $0x188] sm:$0xff] }
  0x74   :  { %287 = vmatpush2.msra.mxu0 %v138_v62  ;;  %288 = vmatprep.mubr.f32.mxu0 %v73_v63  ;;  %v371_v60 = vld [vmem:[#allocation8 + $0x8] sm:$0xff]  ;;  %v386_v62 = vld [vmem:[#allocation8 + $0x80] sm:$0xff] }
  0x75   :  { %358 = vmatpush2.msra.mxu1 %v140_v0  ;;  %359 = vmatprep.mubr.f32.mxu1 %v73_v63  ;;  %v403_v61 = vld [vmem:[#allocation8 + $0x108] sm:$0xff]  ;;  %v418_v63 = vld [vmem:[#allocation8 + $0x180] sm:$0xff] }
  0x76   :  { %289 = vmatmul.mubr.f32.vlgmr.msra.gmra.mxu0 %v72_v1  ;;  %360 = vmatmul.mubr.f32.vlgmr.msra.gmra.mxu1 %v72_v1  ;;  %v370_v0 = vld [vmem:[#allocation8] sm:$0xff] }
  0x77   :  { %600 = vmatprep.subr.mxu0 %v401_v2  ;;  %635 = vmatprep.subr.mxu1 %v433_v3  ;;  %v402_v1 = vld [vmem:[#allocation8 + $0x100] sm:$0xff]  ;;  %v204_v2 = vlaneseq }
  0x78   :  { %601 = vmatpush3.msra.mxu0 %v385_v4  ;;  %636 = vmatpush3.msra.mxu1 %v417_v5 }
  0x79   :  { %602 = vmatprep.subr.mxu0 %v400_v6  ;;  %637 = vmatprep.subr.mxu1 %v432_v7  ;;  %v205_v3 = vshrl.u32 %v204_v2, 7  ;;  %v202_v6 = vld [vmem:[#allocation7] sm:$0xf] }
  0x7a   :  { %603 = vmatpush3.msra.mxu0 %v384_v8  ;;  %638 = vmatpush3.msra.mxu1 %v416_v9 }
  0x7b   :  { %604 = vmatprep.subr.mxu0 %v399_v10  ;;  %639 = vmatprep.subr.mxu1 %v431_v11  ;;  %v214_v4 = vsub.s32 2, %v205_v3  ;;  %v206_v5 = vsub.s32 0, %v205_v3  ;;  %v210_v7 = vsub.s32 1, %v205_v3  ;;  %v218_v8 = vsub.s32 3, %v205_v3 }
  0x7c   :  { %605 = vmatpush3.msra.mxu0 %v383_v12  ;;  %640 = vmatpush3.msra.mxu1 %v415_v13 }
  0x7d   :  { %606 = vmatprep.subr.mxu0 %v398_v14  ;;  %641 = vmatprep.subr.mxu1 %v430_v15  ;;  %v215_v9 = vrot.slane %v202_v6, %v214_v4  ;;  %v207_v10 = vrot.slane %v202_v6, %v206_v5  ;;  %v211_v11 = vrot.slane %v202_v6, %v210_v7 }
  0x7e   :  { %607 = vmatpush3.msra.mxu0 %v382_v16  ;;  %642 = vmatpush3.msra.mxu1 %v414_v17  ;;  %v219_v12 = vrot.slane %v202_v6, %v218_v8 }
  0x7f   :  { %608 = vmatprep.subr.mxu0 %v397_v18  ;;  %643 = vmatprep.subr.mxu1 %v429_v19 }
  0x80   :  { %609 = vmatpush3.msra.mxu0 %v381_v20  ;;  %644 = vmatpush3.msra.mxu1 %v413_v21 }
  0x81   :  { %610 = vmatprep.subr.mxu0 %v396_v22  ;;  %645 = vmatprep.subr.mxu1 %v428_v23 }
  0x82   :  { %611 = vmatpush3.msra.mxu0 %v380_v24  ;;  %646 = vmatpush3.msra.mxu1 %v412_v25 }
  0x83   :  { %612 = vmatprep.subr.mxu0 %v395_v26  ;;  %647 = vmatprep.subr.mxu1 %v427_v27  ;;  %v599_v27 = vld [vmem:[%s848_s4] ss:$0 sm:$0xff] }
  0x84   :  { %613 = vmatpush3.msra.mxu0 %v379_v28  ;;  %648 = vmatpush3.msra.mxu1 %v411_v29 }
  0x85   :  { %614 = vmatprep.subr.mxu0 %v394_v30  ;;  %649 = vmatprep.subr.mxu1 %v426_v31 }
  0x86   :  { %615 = vmatpush3.msra.mxu0 %v378_v32  ;;  %650 = vmatpush3.msra.mxu1 %v410_v33 }
  0x87   :  { %616 = vmatprep.subr.mxu0 %v393_v34  ;;  %651 = vmatprep.subr.mxu1 %v425_v35 }
  0x88   :  { %617 = vmatpush3.msra.mxu0 %v377_v36  ;;  %652 = vmatpush3.msra.mxu1 %v409_v37 }
  0x89   :  { %618 = vmatprep.subr.mxu0 %v392_v38  ;;  %653 = vmatprep.subr.mxu1 %v424_v39 }
  0x8a   :  { %619 = vmatpush3.msra.mxu0 %v376_v40  ;;  %654 = vmatpush3.msra.mxu1 %v408_v41 }
  0x8b   :  { %620 = vmatprep.subr.mxu0 %v391_v42  ;;  %655 = vmatprep.subr.mxu1 %v423_v43 }
  0x8c   :  { %621 = vmatpush3.msra.mxu0 %v375_v44  ;;  %656 = vmatpush3.msra.mxu1 %v407_v45 }
  0x8d   :  { %622 = vmatprep.subr.mxu0 %v390_v46  ;;  %657 = vmatprep.subr.mxu1 %v422_v47 }
  0x8e   :  { %623 = vmatpush3.msra.mxu0 %v374_v48  ;;  %658 = vmatpush3.msra.mxu1 %v406_v49 }
  0x8f   :  { %624 = vmatprep.subr.mxu0 %v389_v50  ;;  %659 = vmatprep.subr.mxu1 %v421_v51 }
  0x90   :  { %625 = vmatpush3.msra.mxu0 %v373_v52  ;;  %660 = vmatpush3.msra.mxu1 %v405_v53 }
  0x91   :  { %626 = vmatprep.subr.mxu0 %v388_v54  ;;  %661 = vmatprep.subr.mxu1 %v420_v55 }
  0x92   :  { %627 = vmatpush3.msra.mxu0 %v372_v56  ;;  %662 = vmatpush3.msra.mxu1 %v404_v57 }
  0x93   :  { %628 = vmatprep.subr.mxu0 %v387_v58  ;;  %663 = vmatprep.subr.mxu1 %v419_v59 }
  0x94   :  { %629 = vmatpush3.msra.mxu0 %v371_v60  ;;  %664 = vmatpush3.msra.mxu1 %v403_v61 }
  0x95   :  { %630 = vmatprep.subr.mxu0 %v386_v62  ;;  %665 = vmatprep.subr.mxu1 %v418_v63 }
  0x96   :  { %631 = vmatpush3.msra.mxu0 %v370_v0  ;;  %666 = vmatpush3.msra.mxu1 %v402_v1 }
 0x136   :  { %v290_v13 = vpop.f32.mrf.mxu0  ;;  %v361_v14 = vpop.f32.mrf.mxu1 }
 0x137   :  { %v362_v15 = vadd.f32 %v361_v14, %v215_v9  ;;  %v291_v16 = vadd.f32 %v290_v13, %v207_v10 }
 0x138   :  { %v292_v17 = vpop.f32.mrf.mxu0  ;;  %v363_v18 = vpop.f32.mrf.mxu1 }
 0x139   :  { %v293_v19 = vadd.f32 %v292_v17, %v211_v11  ;;  %v364_v20 = vadd.f32 %v363_v18, %v219_v12  ;;  %v368_v21 = vmax.f32 %v362_v15, 0.0  ;;  %v366_v24 = vmax.f32 %v291_v16, 0.0 }
 0x13b   :  { %v367_v22 = vmax.f32 %v293_v19, 0.0  ;;  %v369_v23 = vmax.f32 %v364_v20, 0.0 }
 0x13d   :  { %505 = vmatprep.mubr.f32.mxu0 %v367_v22  ;;  %575 = vmatprep.mubr.f32.mxu1 %v369_v23 }
 0x13e   :  { %506 = vmatmul.mubr.f32.vlgmr.msra.gmra.mxu0 %v366_v24  ;;  %576 = vmatmul.mubr.f32.vlgmr.msra.gmra.mxu1 %v368_v21 }
 0x1fe   :  { %v632_v25 = vpop.f32.mrf.mxu0  ;;  %v667_v26 = vpop.f32.mrf.mxu1 }
 0x200   :  { %v633_v28 = vpop.f32.mrf.mxu0  ;;  %v668_v29 = vpop.f32.mrf.mxu1 }
 0x201   :  { %v634_v30 = vadd.f32 %v633_v28, %v632_v25  ;;  %v669_v32 = vadd.f32 %v668_v29, %v667_v26 }
 0x203   :  { %v508_v31 = vadd.f32 %v634_v30, %v599_v27 }
 0x205   :  { %v578_v33 = vadd.f32 %v669_v32, %v508_v31 }
 0x207   :  { %581 = vst [vmem:[#allocation10] sm:$0xff] %v578_v33 }
 0x208   :  { %770 = shalt.err (!%p767_p10)
}
 0x209   :  { %591 = dma.vmem_to_hbm [thread:$0]  %s589_s16, 128, %s849_s5, [#allocation4]  }
 0x20a   :  { %785 = dma.done.wait [#allocation4], 128  }
 0x20b   :  { %786 = vsyncadd [#allocation4], 4294967168 }
 0x20c   :  { %595 = vsyncpa [#allocation3], 1 }
 0x20d   :  { %596 = vsyncpa [#allocation6], 1 }
 0x20e   :  { %597 = vsyncpa [#allocation9], 1 }
 0x20f   :  { %598 = vsyncpa [#allocation4], 1 }

</bundles_post_ra>
